<compile_context>
chip_gen: v6e
topology: v6e:2x2x1
jax: 0.10.0
libtpu: 0.0.40
codegen_flags: <defaults>
</compile_context>

<pallas_src>
import functools

import jax
import jax.numpy as jnp
from jax import lax
from jax.experimental import pallas as pl
from jax.experimental.pallas import tpu as pltpu


# ----------------------------- kernels -------------------------------------


def _compose_pos_tile(T, S, cdtype, sp_ref, tp_ref, pos_ref):
    """pos_ref[t*S + s, :] = sp[s, :] + tp[t, :].  Runs once per lane tile."""
    if T <= 8:
        # Static offsets (alignment visible to the compiler); each frame's
        # temporary dies at its store, so register pressure stays bounded.
        for t in range(T):
            pos_ref[pl.ds(t * S, S), :] = (sp_ref[0].astype(cdtype)
                                           + tp_ref[0, t:t + 1, :].astype(cdtype))
    else:
        def frame(t, carry):
            pos_ref[pl.ds(t * S, S), :] = (
                sp_ref[0].astype(cdtype)
                + tp_ref[0, pl.ds(t, 1), :].astype(cdtype))
            return carry
        lax.fori_loop(0, T, frame, 0)


def _sep_cls_kernel(T, S, cdtype, x_ref, sp_ref, tp_ref, cls_ref, o_ref, pos_ref):
    """sep_pos_embed=True, has_cls=True.

    Blocks (one lane tile of width tc):
      x_ref  : (1, N, tc)   N = T*S patch tokens
      sp_ref : (1, S, tc)   spatial table (f32)
      tp_ref : (1, T, tc)   temporal table (f32)
      cls_ref: (1, 1, tc)   pre-fused cls_token + pos_embed_class (f32)
      o_ref  : (1, N+1, tc)
      pos_ref: (N, tc)      VMEM scratch, composed positional tile
    """
    @pl.when(pl.program_id(1) == 0)            # batch is the inner grid axis
    def _():
        _compose_pos_tile(T, S, cdtype, sp_ref, tp_ref, pos_ref)
    o_ref[0, 0:1, :] = cls_ref[0].astype(o_ref.dtype)
    o_ref[0, 1:, :] = (x_ref[0].astype(cdtype) + pos_ref[...]).astype(o_ref.dtype)


def _sep_nocls_kernel(T, S, cdtype, x_ref, sp_ref, tp_ref, o_ref, pos_ref):
    @pl.when(pl.program_id(1) == 0)
    def _():
        _compose_pos_tile(T, S, cdtype, sp_ref, tp_ref, pos_ref)
    o_ref[0] = (x_ref[0].astype(cdtype) + pos_ref[...]).astype(o_ref.dtype)


def _joint_cls_kernel(cdtype, x_ref, pos_ref, cls_ref, o_ref):
    # pos_ref is the patch-aligned slice pos_embed[:, 1:] (cast to x.dtype);
    # cls_ref is the pre-fused cls_token + pos_embed[:, :1].
    o_ref[0, 0:1, :] = cls_ref[0].astype(o_ref.dtype)
    o_ref[0, 1:, :] = (x_ref[0].astype(cdtype)
                       + pos_ref[0].astype(cdtype)).astype(o_ref.dtype)


def _joint_nocls_kernel(cdtype, x_ref, pos_ref, o_ref):
    o_ref[0] = (x_ref[0].astype(cdtype)
                + pos_ref[0].astype(cdtype)).astype(o_ref.dtype)


# ----------------------------- helpers --------------------------------------


def _vmem_capacity_bytes():
    try:
        cap = getattr(pltpu.get_tpu_info(), "vmem_capacity_bytes", None)
        if cap:
            return int(cap)
    except Exception:
        pass
    return 64 << 20            # conservative fallback (v7x per-core VMEM)


def _compute_dtype(x_dtype):
    if jnp.dtype(x_dtype) != jnp.dtype(jnp.bfloat16):
        return jnp.float32
    try:
        kind = jax.devices()[0].device_kind.lower()
    except Exception:
        kind = ""
    # v6e / v7x have native bf16 VALUs; older generations keep f32 compute
    # (data can still be bf16 in HBM).
    return jnp.bfloat16 if ("v6" in kind or "v7" in kind) else jnp.float32


def _pick_col_block(C, need_fn, budget):
    """Largest multiple-of-128 divisor of C whose full (double-buffered) block
    set fits `budget` bytes.  Prefers tc == C (contiguous DMAs, fewest steps)."""
    if C % 128 != 0:
        # Lane-ragged embedding dim: one full-width tile (block dim == array
        # dim is always legal); stores will be lane-masked.
        return C
    candidates = sorted((c for c in range(128, C + 1, 128) if C % c == 0),
                        reverse=True)
    for c in candidates:
        if need_fn(c) <= budget:
            return c
    # TODO(synk): add an N (row) tiling grid axis for extreme sequence lengths
    # where even a 128-wide lane tile overflows the VMEM budget.
    return candidates[-1]


# ----------------------------- module --------------------------------------


class SpatioTemporalClsPositionalEncoding:
    """JAX/Pallas port of pytorchvideo's SpatioTemporalClsPositionalEncoding."""

    def __init__(self, embed_dim, patch_embed_shape, sep_pos_embed=False,
                 has_cls=True, key=None, col_block=None):
        assert len(patch_embed_shape) == 3, "(T, H, W) expected"
        T, H, W = patch_embed_shape
        self.T = T
        self.S = H * W
        self.C = embed_dim
        self.sep = sep_pos_embed
        self.has_cls = has_cls
        self.col_block = col_block               # optional lane-tile override
        N = self.T * self.S
        num_patches = N + 1 if has_cls else N

        # PyTorch inits these parameters to zeros; use small deterministic
        # random values here so the test is non-trivial.
        key = jax.random.PRNGKey(0) if key is None else key
        k = jax.random.split(key, 4)
        if has_cls:
            self.cls_token = 0.02 * jax.random.normal(k[0], (1, 1, embed_dim), jnp.float32)
        if sep_pos_embed:
            self.pos_embed_spatial = 0.02 * jax.random.normal(
                k[1], (1, self.S, embed_dim), jnp.float32)
            self.pos_embed_temporal = 0.02 * jax.random.normal(
                k[2], (1, self.T, embed_dim), jnp.float32)
            if has_cls:
                self.pos_embed_class = 0.02 * jax.random.normal(
                    k[3], (1, 1, embed_dim), jnp.float32)
                self._cls_row = self.cls_token + self.pos_embed_class
        else:
            self.pos_embed = 0.02 * jax.random.normal(
                k[1], (1, num_patches, embed_dim), jnp.float32)
            if has_cls:
                self._cls_row = self.cls_token + self.pos_embed[:, :1]
                self._pos_patch = self.pos_embed[:, 1:]

    def __call__(self, x):
        assert x.ndim == 3
        B, N, C = x.shape
        assert N == self.T * self.S and C == self.C
        has_cls = 1 if self.has_cls else 0
        N_out = N + has_cls

        cdtype = _compute_dtype(x.dtype)
        x_item = jnp.dtype(x.dtype).itemsize
        c_item = jnp.dtype(cdtype).itemsize

        # Joint-path tables are as large as x; cast them to the activation
        # dtype so their HBM read / VMEM block shrink with bf16 activations.
        # Separable tables are tiny and stay f32.
        if not self.sep:
            pos_full = (self._pos_patch if self.has_cls else self.pos_embed).astype(x.dtype)
            cls_row = self._cls_row.astype(x.dtype) if self.has_cls else None
            p_item = x_item
        else:
            p_item = 4

        def vmem_need(tc):
            spec = (N + N_out) * tc * x_item               # x block + out block
            if self.sep:
                spec += (self.S + self.T + has_cls) * tc * 4
                scratch = N * tc * c_item                  # composed pos tile
            else:
                spec += (N + has_cls) * tc * p_item
                scratch = 0
            return 2 * spec + scratch                      # specs are double-buffered

        cap = _vmem_capacity_bytes()
        usable = cap - max(8 << 20, cap // 8)              # headroom for compiler scratch

        if self.col_block is not None:
            tc = self.col_block
            assert C % tc == 0, "col_block must divide the embedding dim"
        else:
            tc = _pick_col_block(C, vmem_need, usable)
        n_col = C // tc

        batch_spec = lambda rows: pl.BlockSpec((1, rows, tc), lambda c, b: (b, 0, c))
        shared_spec = lambda rows: pl.BlockSpec((1, rows, tc), lambda c, b: (0, 0, c))

        if self.sep:
            scratch_shapes = [pltpu.VMEM((N, tc), cdtype)]
            # Batch axis must stay sequential per core ("arbitrary"): the pos
            # scratch is composed only at the first batch step of a lane tile.
            dims = ("parallel", "arbitrary")
            if self.has_cls:
                kernel = functools.partial(_sep_cls_kernel, self.T, self.S, cdtype)
                in_specs = [batch_spec(N), shared_spec(self.S),
                            shared_spec(self.T), shared_spec(1)]
                args = (x, self.pos_embed_spatial, self.pos_embed_temporal,
                        self._cls_row)
            else:
                kernel = functools.partial(_sep_nocls_kernel, self.T, self.S, cdtype)
                in_specs = [batch_spec(N), shared_spec(self.S), shared_spec(self.T)]
                args = (x, self.pos_embed_spatial, self.pos_embed_temporal)
        else:
            scratch_shapes = []
            dims = ("parallel", "parallel")
            if self.has_cls:
                kernel = functools.partial(_joint_cls_kernel, cdtype)
                in_specs = [batch_spec(N), shared_spec(N), shared_spec(1)]
                args = (x, pos_full, cls_row)
            else:
                kernel = functools.partial(_joint_nocls_kernel, cdtype)
                in_specs = [batch_spec(N), shared_spec(N)]
                args = (x, pos_full)

        vmem_limit = int(min(max(vmem_need(tc) + (2 << 20), 4 << 20), usable))

        # Advisory cost: this kernel is purely HBM-bandwidth-bound.
        if self.sep:
            param_bytes = (self.S + self.T + 2 * has_cls) * C * 4
        else:
            param_bytes = (N + has_cls) * C * p_item
        bytes_accessed = (B * N * C * x_item           # x read
                          + B * N_out * C * x_item     # out write
                          + n_col * param_bytes)       # tables, once per lane tile
        ce = pl.CostEstimate(flops=B * N_out * C, transcendentals=0,
                             bytes_accessed=int(bytes_accessed))

        return pl.pallas_call(
            kernel,
            out_shape=jax.ShapeDtypeStruct((B, N_out, C), x.dtype),
            grid_spec=pltpu.PrefetchScalarGridSpec(
                num_scalar_prefetch=0,
                grid=(n_col, B),                 # lane tiles outer, batch inner:
                in_specs=in_specs,               #   shared pos blocks keep the same
                out_specs=batch_spec(N_out),     #   index across the inner axis and
                scratch_shapes=scratch_shapes),  #   are not re-fetched per batch.
            compiler_params=pltpu.CompilerParams(
                dimension_semantics=dims, vmem_limit_bytes=vmem_limit),
            cost_estimate=ce,
        )(*args)


# ----------------------------- reference -----------------------------------


def reference(mod, x):
    B = x.shape[0]
    if mod.has_cls:
        cls_tokens = jnp.broadcast_to(mod.cls_token, (B, 1, mod.C))
        x = jnp.concatenate([cls_tokens, x], axis=1)
    if mod.sep:
        pos = (jnp.tile(mod.pos_embed_spatial, (1, mod.T, 1))
               + jnp.repeat(mod.pos_embed_temporal, mod.S, axis=1))
        if mod.has_cls:
            pos = jnp.concatenate([mod.pos_embed_class, pos], axis=1)
        x = x + pos
    else:
        x = x + mod.pos_embed
    return x


# ----------------------------- main ----------------------------------------


if __name__ == "__main__":
    key = jax.random.PRNGKey(0)
    kx, kp = jax.random.split(key)

    B, C = 2, 256                # lane-dense embedding dim (multiple of 128)
    T, H, W = 2, 4, 4            # patch_embed_shape
    N = T * H * W                # 32 patch tokens

    x = jax.random.normal(kx, (B, N, C), jnp.float32)

    # sep + cls, forced 128-wide lane tiles -> grid (2, 2); exercises the
    # once-per-lane-tile scratch composition under pl.when.
    mod = SpatioTemporalClsPositionalEncoding(C, (T, H, W), sep_pos_embed=True,
                                              has_cls=True, key=kp, col_block=128)
    out = mod(x)
    jax.block_until_ready(out)
    assert out.shape == (B, N + 1, C)
    ref = reference(mod, x)
    assert jnp.allclose(out, ref, atol=1e-5, rtol=1e-5), float(jnp.max(jnp.abs(out - ref)))

    # joint + cls, auto lane tile (tc == C, fully contiguous DMAs).
    mod2 = SpatioTemporalClsPositionalEncoding(C, (T, H, W), sep_pos_embed=False,
                                               has_cls=True, key=kp)
    out2 = mod2(x)
    jax.block_until_ready(out2)
    ref2 = reference(mod2, x)
    assert jnp.allclose(out2, ref2, atol=1e-5, rtol=1e-5), float(jnp.max(jnp.abs(out2 - ref2)))

    # sep, no cls (fully aligned stores).
    mod3 = SpatioTemporalClsPositionalEncoding(C, (T, H, W), sep_pos_embed=True,
                                               has_cls=False, key=kp)
    out3 = mod3(x)
    jax.block_until_ready(out3)
    ref3 = reference(mod3, x)
    assert jnp.allclose(out3, ref3, atol=1e-5, rtol=1e-5), float(jnp.max(jnp.abs(out3 - ref3)))

    # joint, no cls.
    mod4 = SpatioTemporalClsPositionalEncoding(C, (T, H, W), sep_pos_embed=False,
                                               has_cls=False, key=kp)
    out4 = mod4(x)
    jax.block_until_ready(out4)
    ref4 = reference(mod4, x)
    assert jnp.allclose(out4, ref4, atol=1e-5, rtol=1e-5), float(jnp.max(jnp.abs(out4 - ref4)))

    # bf16 I/O: bf16 compute on v6e/v7x (native bf16 VALU), f32 compute elsewhere.
    xb = x.astype(jnp.bfloat16)
    outb = mod(xb)
    jax.block_until_ready(outb)
    assert outb.dtype == jnp.bfloat16 and outb.shape == (B, N + 1, C)
    refb = reference(mod, xb.astype(jnp.float32)).astype(jnp.bfloat16)
    assert jnp.allclose(outb.astype(jnp.float32), refb.astype(jnp.float32),
                        atol=6.25e-2, rtol=6.25e-2)

    print("KERNEL_OK")
</pallas_src>

<mosaic_0001>
module attributes {stable_mosaic.version = 11 : i64} {
  func.func @_sep_cls_kernel(%arg0: i32, %arg1: i32, %arg2: memref<1x32x128xf32, #tpu.memory_space<vmem>>, %arg3: memref<1x16x128xf32, #tpu.memory_space<vmem>>, %arg4: memref<1x2x128xf32, #tpu.memory_space<vmem>>, %arg5: memref<1x1x128xf32, #tpu.memory_space<vmem>>, %arg6: memref<1x33x128xf32, #tpu.memory_space<vmem>>, %arg7: memref<32x128xf32, #tpu.memory_space<vmem>>) attributes {dimension_semantics = [#tpu.dimension_semantics<parallel>, #tpu.dimension_semantics<arbitrary>], iteration_bounds = array<i64: 2, 2>, scalar_prefetch = 0 : i64, scratch_operands = 1 : i64, tpu.core_type = #tpu.core_type<tc>, window_params = [{transform_indices = @transform_0, window_bounds = array<i64: 1, 32, 128>}, {transform_indices = @transform_1, window_bounds = array<i64: 1, 16, 128>}, {transform_indices = @transform_2, window_bounds = array<i64: 1, 2, 128>}, {transform_indices = @transform_3, window_bounds = array<i64: 1, 1, 128>}, {transform_indices = @transform_4, window_bounds = array<i64: 1, 33, 128>}]} {
    %c0_i32 = arith.constant 0 : i32
    %0 = arith.cmpi eq, %arg1, %c0_i32 : i32
    %1 = arith.extui %0 : i1 to i32
    %c0_i32_0 = arith.constant 0 : i32
    %2 = arith.cmpi ne, %1, %c0_i32_0 : i32
    scf.if %2 {
      %c0_13 = arith.constant 0 : index
      %c0_14 = arith.constant 0 : index
      %c0_15 = arith.constant 0 : index
      %15 = vector.load %arg3[%c0_13, %c0_14, %c0_15] : memref<1x16x128xf32, #tpu.memory_space<vmem>>, vector<1x16x128xf32>
      %16 = vector.shape_cast %15 : vector<1x16x128xf32> to vector<16x128xf32>
      %c0_16 = arith.constant 0 : index
      %c0_17 = arith.constant 0 : index
      %c0_18 = arith.constant 0 : index
      %17 = vector.load %arg4[%c0_16, %c0_17, %c0_18] : memref<1x2x128xf32, #tpu.memory_space<vmem>>, vector<1x1x128xf32>
      %18 = vector.shape_cast %17 : vector<1x1x128xf32> to vector<1x128xf32>
      %19 = vector.broadcast %18 : vector<1x128xf32> to vector<16x128xf32>
      %20 = arith.addf %16, %19 : vector<16x128xf32>
      %c0_19 = arith.constant 0 : index
      %c0_20 = arith.constant 0 : index
      %21 = vector.load %arg7[%c0_19, %c0_20] : memref<32x128xf32, #tpu.memory_space<vmem>>, vector<16x128xf32>
      tpu.vector_store %arg7[%c0_19, %c0_20], %20 {strides = array<i32>} : memref<32x128xf32, #tpu.memory_space<vmem>>, vector<16x128xf32>,
      %c0_21 = arith.constant 0 : index
      %c0_22 = arith.constant 0 : index
      %c0_23 = arith.constant 0 : index
      %22 = vector.load %arg3[%c0_21, %c0_22, %c0_23] : memref<1x16x128xf32, #tpu.memory_space<vmem>>, vector<1x16x128xf32>
      %23 = vector.shape_cast %22 : vector<1x16x128xf32> to vector<16x128xf32>
      %c0_24 = arith.constant 0 : index
      %c1_25 = arith.constant 1 : index
      %c0_26 = arith.constant 0 : index
      %24 = vector.load %arg4[%c0_24, %c1_25, %c0_26] : memref<1x2x128xf32, #tpu.memory_space<vmem>>, vector<1x1x128xf32>
      %25 = vector.shape_cast %24 : vector<1x1x128xf32> to vector<1x128xf32>
      %26 = vector.broadcast %25 : vector<1x128xf32> to vector<16x128xf32>
      %27 = arith.addf %23, %26 : vector<16x128xf32>
      %c16 = arith.constant 16 : index
      %c0_27 = arith.constant 0 : index
      %28 = vector.load %arg7[%c16, %c0_27] : memref<32x128xf32, #tpu.memory_space<vmem>>, vector<16x128xf32>
      tpu.vector_store %arg7[%c16, %c0_27], %27 {strides = array<i32>} : memref<32x128xf32, #tpu.memory_space<vmem>>, vector<16x128xf32>,
    } else {
    }
    %c0 = arith.constant 0 : index
    %c0_1 = arith.constant 0 : index
    %c0_2 = arith.constant 0 : index
    %3 = vector.load %arg5[%c0, %c0_1, %c0_2] : memref<1x1x128xf32, #tpu.memory_space<vmem>>, vector<1x1x128xf32>
    %4 = vector.shape_cast %3 : vector<1x1x128xf32> to vector<1x128xf32>
    %c0_3 = arith.constant 0 : index
    %c0_4 = arith.constant 0 : index
    %c0_5 = arith.constant 0 : index
    %5 = vector.load %arg6[%c0_3, %c0_4, %c0_5] : memref<1x33x128xf32, #tpu.memory_space<vmem>>, vector<1x1x128xf32>
    %6 = vector.shape_cast %5 : vector<1x1x128xf32> to vector<1x128xf32>
    %7 = vector.shape_cast %4 : vector<1x128xf32> to vector<1x1x128xf32>
    tpu.vector_store %arg6[%c0_3, %c0_4, %c0_5], %7 {strides = array<i32>} : memref<1x33x128xf32, #tpu.memory_space<vmem>>, vector<1x1x128xf32>,
    %c0_6 = arith.constant 0 : index
    %c0_7 = arith.constant 0 : index
    %c0_8 = arith.constant 0 : index
    %8 = vector.load %arg2[%c0_6, %c0_7, %c0_8] : memref<1x32x128xf32, #tpu.memory_space<vmem>>, vector<1x32x128xf32>
    %9 = vector.shape_cast %8 : vector<1x32x128xf32> to vector<32x128xf32>
    %c0_9 = arith.constant 0 : index
    %c0_10 = arith.constant 0 : index
    %10 = vector.load %arg7[%c0_9, %c0_10] : memref<32x128xf32, #tpu.memory_space<vmem>>, vector<32x128xf32>
    %11 = arith.addf %9, %10 : vector<32x128xf32>
    %c0_11 = arith.constant 0 : index
    %c1 = arith.constant 1 : index
    %c0_12 = arith.constant 0 : index
    %12 = vector.load %arg6[%c0_11, %c1, %c0_12] : memref<1x33x128xf32, #tpu.memory_space<vmem>>, vector<1x32x128xf32>
    %13 = vector.shape_cast %12 : vector<1x32x128xf32> to vector<32x128xf32>
    %14 = vector.shape_cast %11 : vector<32x128xf32> to vector<1x32x128xf32>
    tpu.vector_store %arg6[%c0_11, %c1, %c0_12], %14 {strides = array<i32>} : memref<1x33x128xf32, #tpu.memory_space<vmem>>, vector<1x32x128xf32>,
    return
  }
  func.func @transform_0(%arg0: i32, %arg1: i32) -> (i32, i32, i32) {
    %c0_i32 = arith.constant 0 : i32
    %c0_i32_0 = arith.constant 0 : i32
    return %arg1, %c0_i32, %arg0 : i32, i32, i32
  }
  func.func @transform_1(%arg0: i32, %arg1: i32) -> (i32, i32, i32) {
    %c0_i32 = arith.constant 0 : i32
    %c0_i32_0 = arith.constant 0 : i32
    %c0_i32_1 = arith.constant 0 : i32
    return %c0_i32, %c0_i32_0, %arg0 : i32, i32, i32
  }
  func.func @transform_2(%arg0: i32, %arg1: i32) -> (i32, i32, i32) {
    %c0_i32 = arith.constant 0 : i32
    %c0_i32_0 = arith.constant 0 : i32
    %c0_i32_1 = arith.constant 0 : i32
    return %c0_i32, %c0_i32_0, %arg0 : i32, i32, i32
  }
  func.func @transform_3(%arg0: i32, %arg1: i32) -> (i32, i32, i32) {
    %c0_i32 = arith.constant 0 : i32
    %c0_i32_0 = arith.constant 0 : i32
    %c0_i32_1 = arith.constant 0 : i32
    return %c0_i32, %c0_i32_0, %arg0 : i32, i32, i32
  }
  func.func @transform_4(%arg0: i32, %arg1: i32) -> (i32, i32, i32) {
    %c0_i32 = arith.constant 0 : i32
    %c0_i32_0 = arith.constant 0 : i32
    return %arg1, %c0_i32, %arg0 : i32, i32, i32
  }
}

</mosaic_0001>

<bundles_post_ra>
// kernel: tpu_custom_call.1
= control target key start
LH: loop header
LB: loop body
LE: loop exit
PB: predicated region body
PF: predicated region fallthrough
CT: control target
= control target key end

     0   :  { %s1153_s0 = inlined_call_operand.hbm [shape: f32[2,32,256], index: 0, kind: input, shape index: {}]   ;;  %s1154_s1 = inlined_call_operand.hbm [shape: f32[1,16,256], index: 1, kind: input, shape index: {}]   ;;  %s1155_s2 = inlined_call_operand.hbm [shape: f32[1,2,256], index: 2, kind: input, shape index: {}]   ;;  %s1156_s3 = inlined_call_operand.vmem [shape: f32[1,1,256], index: 3, kind: input, shape index: {}]   ;;  %s1157_s4 = inlined_call_operand.vmem [shape: f32[2,33,256], index: 4, kind: output, shape index: {}]  }
   0x1   :  { %1172 = sst [smem:[#allocation19_spill]] %s1153_s0 }
   0x2   :  { %1173 = sst [smem:[#allocation20_spill]] %s1154_s1 }
   0x3   :  { %1174 = sst [smem:[#allocation21_spill]] %s1156_s3 }
   0x4   :  { %1175 = sst [smem:[#allocation22_spill]] %s1157_s4 }
   0x5   :  { %9 = vsyncpa [#allocation4], 0 }
   0x6   :  { %11 = vsyncpa [#allocation4 + $0x1], 0 }
   0x7   :  { %12 = vsyncpa [#allocation6], 0 }
   0x8   :  { %14 = vsyncpa [#allocation6 + $0x1], 0  ;;  %s891_s15 = smov 0   ;;  %s893_s16 = smov 0  }
   0x9   :  { %s895_s17 = smov 0   ;;  %s897_s18 = smov 0  }
   0xa   :  { %s899_s19 = smov 0   ;;  %s901_s20 = smov 0  }
   0xb   :  { %s903_s21 = smov 0   ;;  %s905_s22 = smov 0  }
   0xc   :  { %s907_s23 = smov 0   ;;  %s909_s24 = smov 0  }
   0xd   :  { %s911_s25 = smov 0  }
   0xe LB: > { %1176 = sst [smem:[#allocation11_spill]] %s822_s16  ;;  %s945_s26 = sadd.s32 4294967295, %s858_s25   ;;  %s858_s25 = sphi %s911_s25, %s20_s25   ;;  %s854_s24 = sphi %s909_s24, %s1211_s24   ;;  %s850_s23 = sphi %s907_s23, %s1218_s23   ;;  %s846_s22 = sphi %s905_s22, %s1209_s22   ;;  %s842_s21 = sphi %s903_s21, %s1217_s21   ;;  %s838_s20 = sphi %s901_s20, %s1216_s20   ;;  %s834_s19 = sphi %s899_s19, %s1215_s19   ;;  %s830_s18 = sphi %s897_s18, %s1214_s18   ;;  %s826_s17 = sphi %s895_s17, %s1213_s17   ;;  %s822_s16 = sphi %s893_s16, %s1212_s16   ;;  %s818_s15 = sphi %s891_s15, %s1208_s15  }
   0xf   : > { %1177 = sst [smem:[#allocation12_spill]] %s842_s21  ;;  %p49_p0 = scmp.eq.s32.totalorder %s858_s25, 0 }
  0x10   : > { %1178 = sst [smem:[#allocation13_spill]] %s846_s22  ;;  %p55_p1 = scmp.eq.s32.totalorder %s945_s26, 0 }
  0x11   : > { %1179 = sst [smem:[#allocation14_spill]] %s854_s24  ;;  %s67_s27 = sadd.s32 1, %s826_s17 }
  0x12   : > { %p74_p2 = scmp.ne.s32.totalorder %s826_s17, %s822_s16  ;;  %p80_p3 = scmp.ne.s32.totalorder %s822_s16, %s818_s15 }
  0x13   : > { %p1158_p4 = scmp.lt.s32.totalorder %s858_s25, 4  ;;  %s206_s29 = sand.u32 1, %s858_s25  }
  0x14   : > { %p76_p5 = por %p74_p2, %p49_p0  ;;  %p958_p6 = por %p80_p3, %p55_p1 }
  0x15   : > { %s1162_s30 = sand.u32 1, %s826_s17   ;;  %s557_s6 = sshll.u32 %s854_s24, 7 }
  0x16   : > { %s1180_s28 = scalar_select %p958_p6, 1, 0 }
  0x17   : > { %s556_s5 = sshll.u32 %s1162_s30, 4  ;;  %s1182_s1 = sld [smem:[#allocation20_spill]] }
  0x18   : > { %1181 = sst [smem:[#allocation15_spill]] %s1180_s28  ;;  %s210_s10 = scalar_lea.vmem [#allocation5], %s556_s5 }
  0x19   : > { %s216_s11 = sshll.u32 %s210_s10, 4  ;;  %p974_p7 = pnand %p1158_p4, %p76_p5  ;;  %s217_s11 = int_to_ptr.vmem [resolvable:$true] %s216_s11 }
  0x1a   : > { %p560_p8 = scmp.ge.s32.totalorder %s858_s25, 1  ;;  %p248_p9 = scmp.lt.s32.totalorder %s858_s25, 5 }
  0x1b   : > { %s980_s13 = scalar_lea.sflag [#allocation6], %s206_s29  ;;  %p1170_p10 = pneg %p974_p7 }
  0x1c   : > { %s693_s14 = scalar_lea.vmem %s217_s11, 256  ;;  %s860_s15 = smov [#allocation5]  }
  0x1d   : > { %s970_s9 = scalar_lea.hbm %s1182_s1, %s557_s6  ;;  %p694_p11 = scmp.ne.s32.totalorder %s217_s11, %s693_s14 }
  0x1e   : > { %s698_s5 = sshll.u32 %s860_s15, 4  ;;  %s699_s5 = int_to_ptr.vmem [resolvable:$false] %s698_s5 }
  0x1f   : > { %p696_p12 = pnand %p694_p11, %p1170_p10  ;;  %s700_s6 = scalar_lea.vmem %s699_s5, 512 }
  0x20   : > { %p701_p2 = scmp.lt.s32.totalorder %s217_s11, %s699_s5  ;;  %p702_p3 = scmp.lt.s32.totalorder %s700_s6, %s693_s14 }
  0x21   : > { %p697_p13 = pneg %p696_p12 }
  0x22   : > { %p703_p5 = por %p702_p3, %p701_p2 }
  0x24   : > { %p704_p4 = pnand %p703_p5, %p697_p13 }
  0x26   : > { %707 = shalt.err (!%p704_p4)
}
  0x27   : > { %s1159_s7 = smov 256   ;;  %s1160_s29 = smov 128  }
  0x28   : > { %s1161_s8 = smov 8   ;;  %p998_p4 = pnand %p560_p8, %p248_p9 }
  0x29   : > { %584 = dma.hbm_to_vmem [thread:$0]  (!%p974_p7), %s970_s9, 256, %s217_s11, %s980_s13, %s1159_s7, %s1160_s29, %s1161_s8  }
  0x2a   : > { %s29_s14 = sadd.s32 1, %s850_s23  ;;  %s32_s15 = sadd.s32 1, %s854_s24 }
  0x2b   : > { %p30_p11 = scmp.ge.s32.totalorder %s29_s14, 2  ;;  %s41_s5 = sadd.s32 1, %s838_s20 }
  0x2c   : > { %p48_p12 = scmp.ne.s32.totalorder %s838_s20, %s834_s19  ;;  %p54_p13 = scmp.ne.s32.totalorder %s834_s19, %s830_s18 }
  0x2d   : > { %s1220_s14 = smov (%p30_p11, %s29_s14), 0  ;;  %s1222_s15 = smov (!%p30_p11, %s32_s15), %s854_s24 }
  0x2e   : > { %1185 = sst [smem:[#allocation16_spill]] %s1220_s14  ;;  %s36_s9 = ssub.s32 %s850_s23, %s1220_s14 }
  0x2f   : > { %p1014_p8 = por %p49_p0, %p48_p12  ;;  %p34_p9 = scmp.ge.s32.totalorder %s1222_s15, 2 }
  0x30   : > { %p158_p2 = scmp.eq.s32.totalorder %s945_s26, 3  ;;  %s184_s6 = sand.u32 1, %s838_s20  }
  0x31   : > { %s1224_s15 = smov (%p34_p9, %s1222_s15), 0  ;;  %p1026_p3 = por %p55_p1, %p54_p13 }
  0x32   : > { %1187 = sst [smem:[#allocation17_spill]] %s1224_s15  ;;  %p1030_p5 = por %p158_p2, %p48_p12 }
  0x33   : > { %s37_s8 = ssub.s32 %s854_s24, %s1224_s15  ;;  %s553_s30 = sshll.u32 %s184_s6, 5 }
  0x34   : > { %s1189_s29 = scalar_select %p1030_p5, 1, 0 }
  0x35   : > { %s38_s18 = sor.u32 %s37_s8, %s36_s9  ;;  %p65_p0 = scmp.eq.s32.totalorder %s37_s8, 0 }
  0x36   : > { %1190 = sst [smem:[#allocation18_spill]] %s1189_s29  ;;  %p39_p11 = scmp.eq.s32.totalorder %s38_s18, 0 }
  0x37   : > { %s1039_s1 = scalar_select %p65_p0, %s826_s17, %s67_s27  }
  0x38   : > { %s1042_s14 = scalar_select %p39_p11, %s838_s20, %s41_s5  }
  0x39   : > { %s554_s4 = sshll.u32 %s850_s23, 3  ;;  %s188_s3 = scalar_lea.vmem [#allocation3], %s553_s30 }
  0x3a   : > { %s193_s21 = sadd.s32 %s854_s24, %s554_s4  ;;  %s196_s22 = sshll.u32 %s188_s3, 4  ;;  %s197_s22 = int_to_ptr.vmem [resolvable:$true] %s196_s22 }
  0x3b   : > { %s555_s28 = sshll.u32 %s193_s21, 7  ;;  %s1191_s0 = sld [smem:[#allocation19_spill]] }
  0x3c   : > { %p1192_p1 = scmp.lt.s32.totalorder %s858_s25, 4  ;;  %s1194_s27 = sand.u32 1, %s826_s17  }
  0x3d   : > { %s558_s5 = sshll.u32 %s1194_s27, 1  ;;  %s559_s9 = sshll.u32 %s854_s24, 5 }
  0x3e   : > { %p1053_p12 = pnand %p1192_p1, %p1014_p8  ;;  %s185_s18 = scalar_lea.sflag [#allocation4], %s184_s6 }
  0x3f   : > { %s721_s3 = scalar_lea.vmem %s197_s22, 512  ;;  %s864_s4 = smov [#allocation3]  }
  0x40   : > { %p710_p9 = pneg %p1053_p12  ;;  %p722_p13 = scmp.ne.s32.totalorder %s197_s22, %s721_s3 }
  0x41   : > { %s195_s15 = scalar_lea.hbm %s1191_s0, %s555_s28  ;;  %s726_s16 = sshll.u32 %s864_s4, 4  ;;  %s727_s16 = int_to_ptr.vmem [resolvable:$false] %s726_s16 }
  0x42   : > { %p724_p2 = pnand %p722_p13, %p710_p9  ;;  %s728_s21 = scalar_lea.vmem %s727_s16, 1024 }
  0x43   : > { %p729_p11 = scmp.lt.s32.totalorder %s197_s22, %s727_s16  ;;  %p730_p8 = scmp.lt.s32.totalorder %s728_s21, %s721_s3 }
  0x44   : > { %p725_p0 = pneg %p724_p2 }
  0x45   : > { %p731_p1 = por %p730_p8, %p729_p11 }
  0x47   : > { %p732_p10 = pnand %p731_p1, %p725_p0 }
  0x49   : > { %735 = shalt.err (!%p732_p10)
}
  0x4a   : > { %s1195_s28 = smov 8   ;;  %s1196_s30 = smov 128  }
  0x4b   : > { %s1197_s29 = smov 256   ;;  %s235_s27 = scalar_lea.hbm %s1155_s2, %s559_s9 }
  0x4c   : > { %581 = dma.hbm_to_vmem [thread:$0]  (!%p1053_p12), %s195_s15, 512, %s197_s22, %s185_s18, %s1197_s29, %s1196_s30, %s1195_s28  }
  0x4d   : > { %s230_s0 = scalar_lea.vmem [#allocation7], %s558_s5  ;;  %p1198_p13 = pneg %p974_p7 }
  0x4e   : > { %s237_s4 = sshll.u32 %s230_s0, 4  ;;  %s865_s3 = smov [#allocation7]   ;;  %s238_s4 = int_to_ptr.vmem [resolvable:$true] %s237_s4 }
  0x4f   : > { %s749_s24 = scalar_lea.vmem %s238_s4, 32  ;;  %s754_s8 = sshll.u32 %s865_s3, 4  ;;  %s755_s8 = int_to_ptr.vmem [resolvable:$false] %s754_s8 }
  0x50   : > { %p750_p9 = scmp.ne.s32.totalorder %s238_s4, %s749_s24  ;;  %s756_s16 = scalar_lea.vmem %s755_s8, 64 }
  0x51   : > { %p757_p0 = scmp.lt.s32.totalorder %s238_s4, %s755_s8  ;;  %p758_p11 = scmp.lt.s32.totalorder %s756_s16, %s749_s24 }
  0x52   : > { %p752_p2 = pnand %p750_p9, %p1198_p13 }
  0x53   : > { %p759_p12 = por %p758_p11, %p757_p0 }
  0x54   : > { %p753_p10 = pneg %p752_p2 }
  0x56   : > { %p760_p8 = pnand %p759_p12, %p753_p10 }
  0x58   : > { %763 = shalt.err (!%p760_p8)
}
  0x59   : > { %587 = dma.hbm_to_vmem [thread:$0]  (!%p974_p7), %s235_s27, 32, %s238_s4, %s980_s13  }
  0x5a   : > { %252 = sbr.rel (%p998_p4) target bundleno = 146 (0x92), region = 36  ;;  %s254_s0 = sand.u32 (!%p998_p4), 1, %s834_s19  }
  0x5b   : > { %s561_s22 = sshll.u32 (!%p998_p4), %s254_s0, 5  ;;  %s255_s15 = scalar_lea.sflag (!%p998_p4), [#allocation4], %s254_s0 }
  0x5c   : > { %s1079_s5 = scalar_lea.vmem (!%p998_p4), [#allocation3], %s561_s22 }
  0x5f   : > { %809 = dma.done.wait (%p1026_p3), %s255_s15, 512  }
  0x60   : > { %811 = vsyncadd (%p1026_p3), %s255_s15, 4294966784  ;;  %s1199_s24 = sld [smem:[#allocation11_spill]]  ;;  %s263_s9 = sand.u32 1, %s945_s26  }
  0x61   : > { %s264_s10 = scalar_lea.sflag [#allocation6], %s263_s9 }
  0x66   : > { %s265_s13 = sand.u32 1, %s1199_s24  }
  0x67   : > { %s562_s18 = sshll.u32 %s265_s13, 4 }
  0x68   : > { %s267_s21 = scalar_lea.vmem [#allocation5], %s562_s18 }
  0x69   : > { %813 = dma.done.wait (%p958_p6), %s264_s10, 288  }
  0x6a   : > { %815 = vsyncadd (%p958_p6), %s264_s10, 4294967008  ;;  %s1201_s28 = sld [smem:[#allocation13_spill]]  ;;  %s563_s30 = sshll.u32 %s265_s13, 1 }
  0x6b   : > { %s570_s29 = smul.u32 40, %s254_s0  ;;  %s1202_s6 = sld [smem:[#allocation21_spill]] }
  0x6c   : > { %s276_s26 = scalar_lea.vmem [#allocation7], %s563_s30  ;;  %s1203_s3 = sld [smem:[#allocation12_spill]] }
  0x6d   : > { %s1096_s4 = scalar_lea.vmem [#allocation8], %s570_s29 }
  0x70   : > { %p313_p7 = scmp.lt.s32.totalorder %s1201_s28, 1 }
  0x72   : > { %s1226_s28 = smov (!%p313_p7, %s1201_s28), 1  ;;  %p564_p4 = scmp.ne.s32.totalorder %s1203_s3, 0 }
  0x73   : > { %s315_s27 = scalar_lea.vmem %s1202_s6, %s1226_s28 }
  0x74   : > { %319 = sbr.rel (%p564_p4) target bundleno = 127 (0x7f), region = 52 }
  0x79   : > { %v320_v0 = vld [vmem:[%s267_s21] sm:$0xff]  ;;  %v321_v2 = vld [vmem:[%s267_s21 + $0x8] sm:$0xff] }
  0x7a   : > { %v565_v1 = vld [vmem:[%s276_s26] ss:$0 sm:$0xff]  ;;  %v566_v5 = vld [vmem:[%s276_s26 + $0x1] ss:$0 sm:$0xff] }
  0x7b   : > { %v327_v3 = vadd.f32 %v565_v1, %v320_v0  ;;  %v328_v4 = vadd.f32 %v565_v1, %v321_v2  ;;  %v338_v6 = vadd.f32 %v566_v5, %v320_v0  ;;  %v339_v7 = vadd.f32 %v566_v5, %v321_v2 }
  0x7d   : > { %329 = vst [vmem:[#allocation2 + $0x10] sm:$0xff] %v327_v3  ;;  %330 = vst [vmem:[#allocation2] sm:$0xff] %v328_v4 }
  0x7e   : > { %340 = vst [vmem:[#allocation2 + $0x18] sm:$0xff] %v338_v6  ;;  %341 = vst [vmem:[#allocation2 + $0x8] sm:$0xff] %v339_v7 }
  0x7f PF: > { %v342_v8 = vld [vmem:[%s315_s27] sm:$0x1]  ;;  %v345_v12 = vld [vmem:[%s1079_s5 + $0x8] sm:$0xff]  ;;  %v346_v14 = vld [vmem:[%s1079_s5 + $0x10] sm:$0xff]  ;;  %s1205_s16 = sld [smem:[#allocation12_spill]] (%p1030_p5) }
  0x80   : > { %v344_v9 = vld [vmem:[%s1079_s5] sm:$0xff]  ;;  %343 = vst [vmem:[%s1096_s4] sm:$0x1] %v342_v8  ;;  %v347_v17 = vld [vmem:[%s1079_s5 + $0x18] sm:$0xff]  ;;  %s1206_s0 = sld [smem:[#allocation13_spill]] (%p1030_p5) }
  0x81   : > { %s1207_s9 = sld [smem:[#allocation22_spill]] (%p1030_p5) }
  0x84   : > { %v348_v10 = vld [vmem:[#allocation2 + $0x10] sm:$0xff]  ;;  %v349_v13 = vld [vmem:[#allocation2] sm:$0xff]  ;;  %366 = sbr.rel (!%p1030_p5) target bundleno = 146 (0x92), region = 56 }
  0x85   : > { %v352_v11 = vadd.f32 %v348_v10, %v344_v9  ;;  %v353_v15 = vadd.f32 %v349_v13, %v345_v12  ;;  %v350_v16 = vld [vmem:[#allocation2 + $0x18] sm:$0xff]  ;;  %v351_v18 = vld [vmem:[#allocation2 + $0x8] sm:$0xff]  ;;  %s571_s22 = smul.u32 (%p1030_p5), 10, %s1205_s16 }
  0x86   : > { %v354_v19 = vadd.f32 %v350_v16, %v346_v14  ;;  %v355_v20 = vadd.f32 %v351_v18, %v347_v17 }
  0x87   : > { %356 = vst [vmem:[%s1096_s4 + $0x1] sm:$0xff] %v352_v11  ;;  %357 = vst [vmem:[%s1096_s4 + $0x9] sm:$0xff] %v353_v15  ;;  %s368_s15 = sadd.s32 (%p1030_p5), %s1206_s0, %s571_s22 }
  0x88   : > { %358 = vst [vmem:[%s1096_s4 + $0x11] sm:$0xff] %v354_v19  ;;  %359 = vst [vmem:[%s1096_s4 + $0x19] sm:$0xff] %v355_v20  ;;  %s567_s5 = sshll.u32 (%p1030_p5), %s368_s15, 3 }
  0x89   : > { %s370_s13 = scalar_lea.vmem %s1207_s9, %s567_s5 }
  0x8e   : > { %v407_v21 = vld [vmem:[%s1096_s4] sm:$0xff]  ;;  %v409_v22 = vld [vmem:[%s1096_s4 + $0x8] sm:$0xff] }
  0x8f   : > { %v411_v23 = vld [vmem:[%s1096_s4 + $0x10] sm:$0xff]  ;;  %v413_v24 = vld [vmem:[%s1096_s4 + $0x18] sm:$0xff]  ;;  %v415_v25 = vld [vmem:[%s1096_s4 + $0x20] sm:$0xff]  ;;  %408 = vst [vmem:[%s370_s13] sm:$0xff] %v407_v21 }
  0x90   : > { %410 = vst [vmem:[%s370_s13 + $0x10] sm:$0xff] %v409_v22  ;;  %412 = vst [vmem:[%s370_s13 + $0x20] sm:$0xff] %v411_v23 }
  0x91   : > { %414 = vst [vmem:[%s370_s13 + $0x30] sm:$0xff] %v413_v24  ;;  %416 = vst [vmem:[%s370_s13 + $0x40] sm:$0xff] %v415_v25 }
  0x92 PF: > { %s20_s25 = sadd.s32 1, %s858_s25   ;;  %s1208_s15 = sld [smem:[#allocation11_spill]] }
  0x93   : > { %p17_p6 = scmp.ge.s32.totalorder %s20_s25, 6   ;;  %s1209_s22 = sld [smem:[#allocation14_spill]] }
  0x94   : > { %s1210_s10 = sld [smem:[#allocation16_spill]]  ;;  %s1212_s16 = smov %s826_s17 }
  0x95   : > { %s1211_s24 = sld [smem:[#allocation17_spill]]  ;;  %s1213_s17 = smov %s1039_s1 }
  0x96   : > { %s1214_s18 = smov %s834_s19  ;;  %s1215_s19 = smov %s838_s20 }
  0x97   : > { %s1216_s20 = smov %s1042_s14  ;;  %s1217_s21 = smov %s850_s23 }
  0x98   :  { %19 = sbr.rel (!%p17_p6) target bundleno = 14 (0xe), region = 145 }
  0x9a   : > { %s1218_s23 = smov %s1210_s10 }
  0x9d   :  { %432 = vsyncpa [#allocation4], 1 }
  0x9e   :  { %434 = vsyncpa [#allocation4 + $0x1], 1 }
  0x9f   :  { %435 = vsyncpa [#allocation6], 1 }
  0xa0   :  { %437 = vsyncpa [#allocation6 + $0x1], 1 }

</bundles_post_ra>
